<compile_context>
chip_gen: v7x
topology: tpu7x:2x2x1
jax: 0.10.0
libtpu: 0.0.40
codegen_flags: <defaults>
</compile_context>

<pallas_src>
import jax
import jax.numpy as jnp
from jax.experimental import pallas as pl
from jax.experimental.pallas import tpu as pltpu

EPS = 1e-5
C = 3  # fixed by the module: Conv2d(3, 3, 1)


def _stats_kernel(x_ref, w1_ref, b1_ref, ps_ref):
    """Pass 1: per-tile partial sums of y1 = conv1(x) and y1**2, per channel.

    x_ref : (1, C, TR, 128) VMEM tile (one sample, all channels), input dtype
    w1_ref: (C, C)  SMEM f32   1x1-conv weight (channel mixing matrix)
    b1_ref: (C,)    SMEM f32   conv1 bias
    ps_ref: (1, 1, 8, 128) VMEM f32: rows [2c]   = per-lane sum(y1_c)
                                     rows [2c+1] = per-lane sum(y1_c**2)
                                     rows [6:8]  = zero padding (unmasked store)
    """
    xs = [x_ref[0, c, :, :].astype(jnp.float32) for c in range(C)]
    rows = []
    for o in range(C):
        # scalar-broadcast FMAs on the VPU (MXU would use only 3 rows here)
        y = (w1_ref[o, 0] * xs[0] + w1_ref[o, 1] * xs[1]
             + w1_ref[o, 2] * xs[2] + b1_ref[o])
        rows.append(jnp.sum(y, axis=0, keepdims=True))        # (1, 128)
        rows.append(jnp.sum(y * y, axis=0, keepdims=True))    # (1, 128)
    rows.append(jnp.zeros((8 - 2 * C, 128), jnp.float32))
    # Single stacked (8, 128) store instead of six masked single-sublane writes.
    ps_ref[0, 0, :, :] = jnp.concatenate(rows, axis=0)


def _apply_kernel(x_ref, a1_ref, c1_ref, bb_ref, d_ref, o_ref):
    """Pass 2: xn = a1 @ x + c1 (conv1+BN folded); out = xn * (B @ x + d).

    x_ref, o_ref: (1, C, TR, 128) VMEM tiles in the input dtype
    a1/B: (C, C) SMEM f32 ; c1/d: (C,) SMEM f32
    Compute in f32 in-register (works on v5e; cheap relative to HBM), store in
    the I/O dtype.
    """
    xs = [x_ref[0, c, :, :].astype(jnp.float32) for c in range(C)]
    for o in range(C):
        xn = (a1_ref[o, 0] * xs[0] + a1_ref[o, 1] * xs[1]
              + a1_ref[o, 2] * xs[2] + c1_ref[o])
        z = (bb_ref[o, 0] * xs[0] + bb_ref[o, 1] * xs[1]
             + bb_ref[o, 2] * xs[2] + d_ref[o])
        o_ref[0, o, :, :] = (xn * z).astype(o_ref.dtype)


def _round_up(x, m):
    return -(-x // m) * m


def _pick_tile_rows(R, n_batch, max_tr=2048):
    """Fixed near-cap tile height (rows of 128 lanes), multiple of 8, with tail
    padding handled by the wrapper. ~3 MiB f32 tiles (fits 32 MiB VMEM budget
    with double buffering on every chip generation). When N == 1, keeps >= 2
    grid blocks so v7x can shard across its 2 TensorCores."""
    if R <= max_tr:
        if n_batch >= 2 or R <= 8:
            tr = R                                   # whole plane per sample
        else:
            tr = _round_up(pl.cdiv(R, 2), 8)         # N==1: keep T >= 2
    else:
        tr = max_tr
    t = pl.cdiv(R, tr)
    return tr, t


def fused_forward(x_nchw, w1, b1, gamma, beta, w2, b2):
    """x_nchw: (N, 3, H, W) f32/bf16; w1/w2: (3, 3) 1x1-conv weights; rest (3,)."""
    N, Cin, H, W = x_nchw.shape
    assert Cin == C
    in_dtype = x_nchw.dtype
    HW = H * W
    f32 = jnp.float32

    R = pl.cdiv(HW, 128)            # rows of 128 lanes (before row padding)
    TR, T = _pick_tile_rows(R, N)
    R_pad = T * TR
    pad = R_pad * 128 - HW          # zero-padded spatial tail (< TR*128)

    # Free reshape (no transpose): each channel becomes a dense (R_pad, 128)
    # plane. Padding (when needed) is a one-off copy; aligned shapes pay nothing.
    x_flat = x_nchw.reshape(N, C, HW)
    if pad:
        x_flat = jnp.pad(x_flat, ((0, 0), (0, 0), (0, pad)))
    x4 = x_flat.reshape(N, C, R_pad, 128)

    w1 = w1.astype(f32); b1 = b1.astype(f32)
    w2 = w2.astype(f32); b2 = b2.astype(f32)
    gamma = gamma.astype(f32); beta = beta.astype(f32)

    smem = pl.BlockSpec(memory_space=pltpu.MemorySpace.SMEM)
    cparams = pltpu.CompilerParams(
        dimension_semantics=("parallel", "parallel"),   # megacore-shard on v7x
        vmem_limit_bytes=32 * 1024 * 1024,              # safe on v5e/v6e/v7x
    )

    # ---- Pass 1: streaming conv1 + partial BN statistics -------------------
    partial = pl.pallas_call(
        _stats_kernel,
        out_shape=jax.ShapeDtypeStruct((N, T, 8, 128), f32),
        grid=(N, T),
        in_specs=[
            pl.BlockSpec((1, C, TR, 128), lambda n, t: (n, 0, t, 0)),  # x tile
            smem,   # w1
            smem,   # b1
        ],
        out_specs=pl.BlockSpec((1, 1, 8, 128), lambda n, t: (n, t, 0, 0)),
        compiler_params=cparams,
    )(x4, w1, b1)

    # Tiny final reduction + BN fold (a few KB -> plain XLA).
    psum = jnp.sum(partial, axis=(0, 1, 3))                 # (8,)
    raw_sum = psum[0:2 * C:2]
    raw_sq = psum[1:2 * C:2]
    # Padded positions hold x == 0 exactly, so conv1 there emits exactly b1;
    # remove that known contribution analytically instead of masking in-kernel.
    total_pad = jnp.float32(N * pad)
    s = raw_sum - total_pad * b1
    q = raw_sq - total_pad * b1 * b1
    P = jnp.float32(N * HW)
    mean = s / P
    # TODO(synk): E[y^2]-E[y]^2 in f32 can cancel for very large N*H*W; switch
    # to a shifted / hierarchical accumulation if tighter tolerances are needed.
    var = jnp.maximum(q / P - mean * mean, 0.0)             # biased var (training BN)

    bn_scale = gamma * jax.lax.rsqrt(var + EPS)
    bn_shift = beta - mean * bn_scale
    a1 = w1 * bn_scale[:, None]        # conv1 + BN folded into one affine map
    c1 = b1 * bn_scale + bn_shift
    a2 = 0.5 * w2                      # conv2(x/2) == (0.5*w2) @ x + b2
    bb = a2 @ a1                       # second factor computed straight from x
    d = a2 @ c1 + b2

    # ---- Pass 2: normalize + conv2 + multiply -------------------------------
    out4 = pl.pallas_call(
        _apply_kernel,
        out_shape=jax.ShapeDtypeStruct((N, C, R_pad, 128), in_dtype),
        grid=(N, T),
        in_specs=[
            pl.BlockSpec((1, C, TR, 128), lambda n, t: (n, 0, t, 0)),  # x tile
            smem, smem, smem, smem,                                    # a1,c1,B,d
        ],
        out_specs=pl.BlockSpec((1, C, TR, 128), lambda n, t: (n, 0, t, 0)),
        compiler_params=cparams,
    )(x4, a1, c1, bb, d)

    out = out4.reshape(N, C, R_pad * 128)
    if pad:
        out = out[:, :, :HW]
    return out.reshape(N, C, H, W)


def reference_forward(x_nchw, w1, b1, gamma, beta, w2, b2):
    """Pure-JAX reference (training-mode BN) for a correctness check."""
    x_nchw = x_nchw.astype(jnp.float32)
    y1 = jnp.einsum('oc,nchw->nohw', w1, x_nchw) + b1[None, :, None, None]
    mean = jnp.mean(y1, axis=(0, 2, 3), keepdims=True)
    var = jnp.mean((y1 - mean) ** 2, axis=(0, 2, 3), keepdims=True)
    xn = (y1 - mean) / jnp.sqrt(var + EPS) * gamma[None, :, None, None] \
        + beta[None, :, None, None]
    y2 = jnp.einsum('oc,nchw->nohw', w2, xn * 0.5) + b2[None, :, None, None]
    return xn * y2


if __name__ == "__main__":
    key = jax.random.PRNGKey(0)
    kx, k1, k2, k3, k4, k5, k6 = jax.random.split(key, 7)

    # Deterministic parameter init (1x1 conv kernels stored as (Cout, Cin)).
    w1 = jax.random.normal(k1, (C, C), dtype=jnp.float32) * 0.5
    b1 = jax.random.normal(k2, (C,), dtype=jnp.float32) * 0.1
    w2 = jax.random.normal(k3, (C, C), dtype=jnp.float32) * 0.5
    b2 = jax.random.normal(k4, (C,), dtype=jnp.float32) * 0.1
    gamma = 1.0 + 0.1 * jax.random.normal(k5, (C,), dtype=jnp.float32)
    beta = 0.1 * jax.random.normal(k6, (C,), dtype=jnp.float32)

    # Case 1: the module's own input shape (1, 3, 3, 3) -> exercises lane/tail
    # padding (H*W = 9 is not a multiple of 128).
    xa = jax.random.normal(kx, (1, C, 3, 3), dtype=jnp.float32)
    out_a = jax.block_until_ready(fused_forward(xa, w1, b1, gamma, beta, w2, b2))
    ref_a = reference_forward(xa, w1, b1, gamma, beta, w2, b2)
    assert out_a.shape == xa.shape and out_a.dtype == xa.dtype
    assert jnp.allclose(out_a, ref_a, atol=1e-4, rtol=1e-4), "case1 mismatch"

    # Case 2: small batched shape, f32 I/O.
    xb = jax.random.normal(kx, (2, C, 16, 16), dtype=jnp.float32)
    out_b = jax.block_until_ready(fused_forward(xb, w1, b1, gamma, beta, w2, b2))
    ref_b = reference_forward(xb, w1, b1, gamma, beta, w2, b2)
    assert out_b.shape == xb.shape
    assert jnp.allclose(out_b, ref_b, atol=1e-4, rtol=1e-4), "case2 mismatch"

    # Case 3: same shape, bf16 I/O (native-dtype streaming path, bf16 output).
    xc = xb.astype(jnp.bfloat16)
    out_c = jax.block_until_ready(fused_forward(xc, w1, b1, gamma, beta, w2, b2))
    ref_c = reference_forward(xc, w1, b1, gamma, beta, w2, b2)
    assert out_c.dtype == jnp.bfloat16
    assert jnp.allclose(out_c.astype(jnp.float32), ref_c, atol=5e-2, rtol=5e-2), \
        "case3 mismatch"

    print("KERNEL_OK")
</pallas_src>

<mosaic_0001>
module attributes {stable_mosaic.version = 11 : i64} {
  func.func @_stats_kernel(%arg0: i32, %arg1: i32, %arg2: memref<1x3x1x128xf32, #tpu.memory_space<vmem>>, %arg3: memref<3x3xf32, #tpu.memory_space<smem>>, %arg4: memref<3xf32, #tpu.memory_space<smem>>, %arg5: memref<1x1x8x128xf32, #tpu.memory_space<vmem>>) attributes {dimension_semantics = [#tpu.dimension_semantics<parallel>, #tpu.dimension_semantics<parallel>], iteration_bounds = array<i64: 1, 1>, scalar_prefetch = 0 : i64, scratch_operands = 0 : i64, tpu.core_type = #tpu.core_type<tc>, window_params = [{transform_indices = @transform_0, window_bounds = array<i64: 1, 3, 1, 128>}, {transform_indices = @transform_1, window_bounds = array<i64: 3, 3>}, {transform_indices = @transform_2, window_bounds = array<i64: 3>}, {transform_indices = @transform_3, window_bounds = array<i64: 1, 1, 8, 128>}]} {
    %c0 = arith.constant 0 : index
    %c0_0 = arith.constant 0 : index
    %c0_1 = arith.constant 0 : index
    %c0_2 = arith.constant 0 : index
    %0 = vector.load %arg2[%c0, %c0_0, %c0_1, %c0_2] : memref<1x3x1x128xf32, #tpu.memory_space<vmem>>, vector<1x1x1x128xf32>
    %1 = vector.shape_cast %0 : vector<1x1x1x128xf32> to vector<1x128xf32>
    %c0_3 = arith.constant 0 : index
    %c1 = arith.constant 1 : index
    %c0_4 = arith.constant 0 : index
    %c0_5 = arith.constant 0 : index
    %2 = vector.load %arg2[%c0_3, %c1, %c0_4, %c0_5] : memref<1x3x1x128xf32, #tpu.memory_space<vmem>>, vector<1x1x1x128xf32>
    %3 = vector.shape_cast %2 : vector<1x1x1x128xf32> to vector<1x128xf32>
    %c0_6 = arith.constant 0 : index
    %c2 = arith.constant 2 : index
    %c0_7 = arith.constant 0 : index
    %c0_8 = arith.constant 0 : index
    %4 = vector.load %arg2[%c0_6, %c2, %c0_7, %c0_8] : memref<1x3x1x128xf32, #tpu.memory_space<vmem>>, vector<1x1x1x128xf32>
    %5 = vector.shape_cast %4 : vector<1x1x1x128xf32> to vector<1x128xf32>
    %c0_9 = arith.constant 0 : index
    %c0_10 = arith.constant 0 : index
    %6 = memref.load %arg3[%c0_9, %c0_10] : memref<3x3xf32, #tpu.memory_space<smem>>
    %7 = vector.broadcast %6 : f32 to vector<1x128xf32>
    %8 = arith.mulf %7, %1 : vector<1x128xf32>
    %c0_11 = arith.constant 0 : index
    %c1_12 = arith.constant 1 : index
    %9 = memref.load %arg3[%c0_11, %c1_12] : memref<3x3xf32, #tpu.memory_space<smem>>
    %10 = vector.broadcast %9 : f32 to vector<1x128xf32>
    %11 = arith.mulf %10, %3 : vector<1x128xf32>
    %12 = arith.addf %8, %11 : vector<1x128xf32>
    %c0_13 = arith.constant 0 : index
    %c2_14 = arith.constant 2 : index
    %13 = memref.load %arg3[%c0_13, %c2_14] : memref<3x3xf32, #tpu.memory_space<smem>>
    %14 = vector.broadcast %13 : f32 to vector<1x128xf32>
    %15 = arith.mulf %14, %5 : vector<1x128xf32>
    %16 = arith.addf %12, %15 : vector<1x128xf32>
    %c0_15 = arith.constant 0 : index
    %17 = memref.load %arg4[%c0_15] : memref<3xf32, #tpu.memory_space<smem>>
    %18 = vector.broadcast %17 : f32 to vector<1x128xf32>
    %19 = arith.addf %16, %18 : vector<1x128xf32>
    %cst = arith.constant dense<0.000000e+00> : vector<128xf32>
    %20 = vector.multi_reduction <add>, %19, %cst [0] : vector<1x128xf32> to vector<128xf32>
    %21 = vector.shape_cast %20 : vector<128xf32> to vector<1x128xf32>
    %22 = arith.mulf %19, %19 : vector<1x128xf32>
    %cst_16 = arith.constant dense<0.000000e+00> : vector<128xf32>
    %23 = vector.multi_reduction <add>, %22, %cst_16 [0] : vector<1x128xf32> to vector<128xf32>
    %24 = vector.shape_cast %23 : vector<128xf32> to vector<1x128xf32>
    %c1_17 = arith.constant 1 : index
    %c0_18 = arith.constant 0 : index
    %25 = memref.load %arg3[%c1_17, %c0_18] : memref<3x3xf32, #tpu.memory_space<smem>>
    %26 = vector.broadcast %25 : f32 to vector<1x128xf32>
    %27 = arith.mulf %26, %1 : vector<1x128xf32>
    %c1_19 = arith.constant 1 : index
    %c1_20 = arith.constant 1 : index
    %28 = memref.load %arg3[%c1_19, %c1_20] : memref<3x3xf32, #tpu.memory_space<smem>>
    %29 = vector.broadcast %28 : f32 to vector<1x128xf32>
    %30 = arith.mulf %29, %3 : vector<1x128xf32>
    %31 = arith.addf %27, %30 : vector<1x128xf32>
    %c1_21 = arith.constant 1 : index
    %c2_22 = arith.constant 2 : index
    %32 = memref.load %arg3[%c1_21, %c2_22] : memref<3x3xf32, #tpu.memory_space<smem>>
    %33 = vector.broadcast %32 : f32 to vector<1x128xf32>
    %34 = arith.mulf %33, %5 : vector<1x128xf32>
    %35 = arith.addf %31, %34 : vector<1x128xf32>
    %c1_23 = arith.constant 1 : index
    %36 = memref.load %arg4[%c1_23] : memref<3xf32, #tpu.memory_space<smem>>
    %37 = vector.broadcast %36 : f32 to vector<1x128xf32>
    %38 = arith.addf %35, %37 : vector<1x128xf32>
    %cst_24 = arith.constant dense<0.000000e+00> : vector<128xf32>
    %39 = vector.multi_reduction <add>, %38, %cst_24 [0] : vector<1x128xf32> to vector<128xf32>
    %40 = vector.shape_cast %39 : vector<128xf32> to vector<1x128xf32>
    %41 = arith.mulf %38, %38 : vector<1x128xf32>
    %cst_25 = arith.constant dense<0.000000e+00> : vector<128xf32>
    %42 = vector.multi_reduction <add>, %41, %cst_25 [0] : vector<1x128xf32> to vector<128xf32>
    %43 = vector.shape_cast %42 : vector<128xf32> to vector<1x128xf32>
    %c2_26 = arith.constant 2 : index
    %c0_27 = arith.constant 0 : index
    %44 = memref.load %arg3[%c2_26, %c0_27] : memref<3x3xf32, #tpu.memory_space<smem>>
    %45 = vector.broadcast %44 : f32 to vector<1x128xf32>
    %46 = arith.mulf %45, %1 : vector<1x128xf32>
    %c2_28 = arith.constant 2 : index
    %c1_29 = arith.constant 1 : index
    %47 = memref.load %arg3[%c2_28, %c1_29] : memref<3x3xf32, #tpu.memory_space<smem>>
    %48 = vector.broadcast %47 : f32 to vector<1x128xf32>
    %49 = arith.mulf %48, %3 : vector<1x128xf32>
    %50 = arith.addf %46, %49 : vector<1x128xf32>
    %c2_30 = arith.constant 2 : index
    %c2_31 = arith.constant 2 : index
    %51 = memref.load %arg3[%c2_30, %c2_31] : memref<3x3xf32, #tpu.memory_space<smem>>
    %52 = vector.broadcast %51 : f32 to vector<1x128xf32>
    %53 = arith.mulf %52, %5 : vector<1x128xf32>
    %54 = arith.addf %50, %53 : vector<1x128xf32>
    %c2_32 = arith.constant 2 : index
    %55 = memref.load %arg4[%c2_32] : memref<3xf32, #tpu.memory_space<smem>>
    %56 = vector.broadcast %55 : f32 to vector<1x128xf32>
    %57 = arith.addf %54, %56 : vector<1x128xf32>
    %cst_33 = arith.constant dense<0.000000e+00> : vector<128xf32>
    %58 = vector.multi_reduction <add>, %57, %cst_33 [0] : vector<1x128xf32> to vector<128xf32>
    %59 = vector.shape_cast %58 : vector<128xf32> to vector<1x128xf32>
    %60 = arith.mulf %57, %57 : vector<1x128xf32>
    %cst_34 = arith.constant dense<0.000000e+00> : vector<128xf32>
    %61 = vector.multi_reduction <add>, %60, %cst_34 [0] : vector<1x128xf32> to vector<128xf32>
    %62 = vector.shape_cast %61 : vector<128xf32> to vector<1x128xf32>
    %cst_35 = arith.constant 0.000000e+00 : f32
    %63 = vector.broadcast %cst_35 : f32 to vector<2x128xf32>
    %64 = tpu.concatenate %21, %24, %40, %43, %59, %62, %63 in 0 : vector<1x128xf32>, vector<1x128xf32>, vector<1x128xf32>, vector<1x128xf32>, vector<1x128xf32>, vector<1x128xf32>, vector<2x128xf32> -> vector<8x128xf32>
    %c0_36 = arith.constant 0 : index
    %c0_37 = arith.constant 0 : index
    %c0_38 = arith.constant 0 : index
    %c0_39 = arith.constant 0 : index
    %65 = vector.load %arg5[%c0_36, %c0_37, %c0_38, %c0_39] : memref<1x1x8x128xf32, #tpu.memory_space<vmem>>, vector<1x1x8x128xf32>
    %66 = vector.shape_cast %65 : vector<1x1x8x128xf32> to vector<8x128xf32>
    %67 = vector.shape_cast %64 : vector<8x128xf32> to vector<1x1x8x128xf32>
    tpu.vector_store %arg5[%c0_36, %c0_37, %c0_38, %c0_39], %67 {strides = array<i32>} : memref<1x1x8x128xf32, #tpu.memory_space<vmem>>, vector<1x1x8x128xf32>,
    return
  }
  func.func @transform_0(%arg0: i32, %arg1: i32) -> (i32, i32, i32, i32) {
    %c0_i32 = arith.constant 0 : i32
    %c0_i32_0 = arith.constant 0 : i32
    %c0_i32_1 = arith.constant 0 : i32
    return %arg0, %c0_i32, %arg1, %c0_i32_0 : i32, i32, i32, i32
  }
  func.func @transform_1(%arg0: i32, %arg1: i32) -> (i32, i32) {
    %c0_i32 = arith.constant 0 : i32
    %c0_i32_0 = arith.constant 0 : i32
    %c0_i32_1 = arith.constant 0 : i32
    return %c0_i32, %c0_i32_0 : i32, i32
  }
  func.func @transform_2(%arg0: i32, %arg1: i32) -> i32 {
    %c0_i32 = arith.constant 0 : i32
    %c0_i32_0 = arith.constant 0 : i32
    return %c0_i32 : i32
  }
  func.func @transform_3(%arg0: i32, %arg1: i32) -> (i32, i32, i32, i32) {
    %c0_i32 = arith.constant 0 : i32
    %c0_i32_0 = arith.constant 0 : i32
    %c0_i32_1 = arith.constant 0 : i32
    return %arg0, %arg1, %c0_i32, %c0_i32_0 : i32, i32, i32, i32
  }
}

</mosaic_0001>

<bundles_post_ra>
// kernel: tpu_custom_call.1
= control target key start
LH: loop header
LB: loop body
LE: loop exit
PB: predicated region body
PF: predicated region fallthrough
CT: control target
= control target key end

     0   :  { %8 = vsyncpa [#allocation3], 0  ;;  %s332_s0 = inlined_call_operand.hbm [shape: f32[1,3,1,128], index: 0, kind: input, shape index: {}]   ;;  %s333_s1 = inlined_call_operand.hbm [shape: f32[3,3], index: 1, kind: input, shape index: {}]   ;;  %s334_s2 = inlined_call_operand.vmem [shape: f32[3], index: 2, kind: input, shape index: {}]   ;;  %s335_s3 = inlined_call_operand.hbm [shape: f32[1,1,8,128], index: 3, kind: output, shape index: {}]  }
   0x1   :  { %9 = vsyncpa [#allocation5], 0 }
   0x2   :  { %10 = vsyncpa [#allocation6], 0 }
   0x3   :  { %11 = vsyncpa [#allocation4], 0  ;;  %s258_s12 = smov [#allocation2]   ;;  %s184_s16 = scalar_lea.hbm %s332_s0, 48 }
   0x4   :  { %s17_s13 = sshll.u32 %s258_s12, 4  ;;  %p185_p0 = scmp.ne.s32.totalorder %s332_s0, %s184_s16  ;;  %s18_s13 = int_to_ptr.vmem [resolvable:$true] %s17_s13 }
   0x5   :  { %p188_p1 = scmp.lt.u32.totalorder %s184_s16, %s332_s0 }
   0x7   :  { %p190_p2 = pnand %p188_p1, %p185_p0 }
   0x9   :  { %193 = shalt.err (!%p190_p2)
}
   0xa   :  { %s194_s21 = scalar_lea.vmem %s18_s13, 48  ;;  %s198_s22 = scalar_lea.vmem %s18_s13, 64 }
   0xb   :  { %p195_p3 = scmp.ne.s32.totalorder %s18_s13, %s194_s21  ;;  %p199_p4 = scmp.lt.s32.totalorder %s18_s13, %s18_s13 }
   0xc   :  { %p200_p5 = scmp.lt.s32.totalorder %s198_s22, %s194_s21 }
   0xe   :  { %p201_p6 = por %p200_p5, %p199_p4 }
  0x10   :  { %p202_p7 = pnand %p201_p6, %p195_p3 }
  0x12   :  { %205 = shalt.err (!%p202_p7)
}
  0x13   :  { %s259_s23 = smov 16   ;;  %s260_s24 = smov 1  }
  0x14   :  { %23 = dma.hbm_to_vmem [thread:$0]  %s332_s0, 48, %s18_s13, [#allocation3], %s259_s23, %s259_s23, %s260_s24  }
  0x15   :  { %s206_s29 = scalar_lea.hbm %s333_s1, 64 }
  0x16   :  { %p207_p8 = scmp.ne.s32.totalorder %s333_s1, %s206_s29  ;;  %p210_p9 = scmp.lt.u32.totalorder %s206_s29, %s333_s1 }
  0x18   :  { %p212_p10 = pnand %p210_p9, %p207_p8 }
  0x1a   :  { %215 = shalt.err (!%p212_p10)
}
  0x1b   :  { %s261_s7 = smov [#allocation7]   ;;  %s38_s11 = sshll.u32 %s334_s2, 4  ;;  %s39_s11 = int_to_ptr.vmem [resolvable:$true] %s38_s11 }
  0x1c   :  { %31 = dma.hbm_to_smem %s333_s1, 64, %s261_s7, [#allocation5]  }
  0x1d   :  { %s216_s12 = scalar_lea.vmem %s39_s11, 16  ;;  %p221_p12 = scmp.lt.s32.totalorder %s39_s11, %s39_s11 }
  0x1e   :  { %p217_p11 = scmp.ne.s32.totalorder %s39_s11, %s216_s12  ;;  %p222_p13 = scmp.lt.s32.totalorder %s216_s12, %s216_s12 }
  0x20   :  { %p223_p0 = por %p222_p13, %p221_p12 }
  0x22   :  { %p224_p1 = pnand %p223_p0, %p217_p11 }
  0x24   :  { %227 = shalt.err (!%p224_p1)
}
  0x25   :  { %s262_s13 = smov [#allocation8]  }
  0x26   :  { %41 = dma.vmem_to_smem %s39_s11, 16, %s262_s13, [#allocation6]  }
  0x27   :  { %250 = dma.done.wait [#allocation3], 48  }
  0x28   :  { %251 = vsyncadd [#allocation3], 4294967248 }
  0x29   :  { %252 = dma.done.wait [#allocation5], 64  }
  0x2a   :  { %253 = vsyncadd [#allocation5], 4294967232 }
  0x2b   :  { %254 = dma.done.wait [#allocation6], 16  }
  0x2c   :  { %255 = vsyncadd [#allocation6], 4294967280 }
  0x2d   :  { %51 = sfence }
  0x2e   :  { %s57_s1 = sld [smem:[#allocation7]]  ;;  %s168_s14 = sld [smem:[#allocation7 + $0x1]]  ;;  %v52_v0 = vld [vmem:[#allocation2] sm:$0x1]  ;;  %v54_v1 = vld [vmem:[#allocation2 + $0x1] sm:$0x1]  ;;  %v109_v2 = vlaneseq }
  0x2f   :  { %s169_s2 = sld [smem:[#allocation7 + $0x2]]  ;;  %s311_s15 = sld [smem:[#allocation8]]  ;;  %v56_v3 = vld [vmem:[#allocation2 + $0x2] sm:$0x1]  ;;  %vm138_vm0 = vcmask 1040384   ;;  %vm140_vm1 = vcmask 1041408  }
  0x30   :  { %s170_s16 = sld [smem:[#allocation7 + $0x80]]  ;;  %s171_s17 = sld [smem:[#allocation7 + $0x81]]  ;;  %v110_v12 = vshrl.u32 %v109_v2, 7  ;;  %vm142_vm2 = vcmask 1042432   ;;  %vm144_vm3 = vcmask 1043456   ;;  %vm146_vm4 = vcmask 1044480  }
  0x31   :  { %s172_s18 = sld [smem:[#allocation7 + $0x82]]  ;;  %s313_s19 = sld [smem:[#allocation8 + $0x1]]  ;;  %vm148_vm5 = vcmask 1045504  }
  0x32   :  { %s174_s20 = sld [smem:[#allocation7 + $0x100]]  ;;  %s175_s21 = sld [smem:[#allocation7 + $0x101]]  ;;  %v111_v27 = vsub.s32 0, %v110_v12 }
  0x33   :  { %s176_s22 = sld [smem:[#allocation7 + $0x102]]  ;;  %s263_s24 = smov [#allocation9]  }
  0x34   :  { %v58_v4 = vstv %s57_s1  ;;  %v61_v5 = vstv %s168_s14  ;;  %s315_s23 = sld [smem:[#allocation8 + $0x2]]  ;;  %s157_s25 = sshll.u32 %s263_s24, 4  ;;  %s158_s25 = int_to_ptr.vmem [resolvable:$true] %s157_s25 }
  0x35   :  { %v59_v6 = vmul.f32 %v58_v4, %v52_v0  ;;  %v62_v7 = vmul.f32 %v61_v5, %v54_v1  ;;  %v65_v8 = vstv %s169_s2  ;;  %v69_v17 = vstv %s311_s15  ;;  %s228_s26 = scalar_lea.vmem %s158_s25, 128  ;;  %p233_p3 = scmp.lt.s32.totalorder %s158_s25, %s158_s25 }
  0x36   :  { %v66_v9 = vmul.f32 %v65_v8, %v56_v3  ;;  %v75_v10 = vstv %s170_s16  ;;  %v78_v11 = vstv %s171_s17  ;;  %p229_p2 = scmp.ne.s32.totalorder %s158_s25, %s228_s26  ;;  %p234_p4 = scmp.lt.s32.totalorder %s228_s26, %s228_s26 }
  0x37   :  { %v63_v13 = vadd.f32 %v62_v7, %v59_v6  ;;  %v76_v14 = vmul.f32 %v75_v10, %v52_v0  ;;  %v79_v15 = vmul.f32 %v78_v11, %v54_v1  ;;  %v82_v16 = vstv %s172_s18 }
  0x38   :  { %v83_v18 = vmul.f32 %v82_v16, %v56_v3  ;;  %v92_v19 = vstv %s174_s20  ;;  %v95_v20 = vstv %s175_s21  ;;  %v86_v25 = vstv %s313_s19  ;;  %p235_p5 = por %p234_p4, %p233_p3 }
  0x39   :  { %v67_v21 = vadd.f32 %v66_v9, %v63_v13  ;;  %v80_v22 = vadd.f32 %v79_v15, %v76_v14  ;;  %v93_v23 = vmul.f32 %v92_v19, %v52_v0  ;;  %v96_v24 = vmul.f32 %v95_v20, %v54_v1 }
  0x3a   :  { %v99_v26 = vstv %s176_s22  ;;  %v103_v32 = vstv %s315_s23  ;;  %p236_p6 = pnand %p235_p5, %p229_p2 }
  0x3b   :  { %v70_v28 = vadd.f32 %v69_v17, %v67_v21  ;;  %v84_v29 = vadd.f32 %v83_v18, %v80_v22  ;;  %v97_v30 = vadd.f32 %v96_v24, %v93_v23  ;;  %v100_v31 = vmul.f32 %v99_v26, %v56_v3 }
  0x3d   :  { %v72_v33 = vmul.f32 %v70_v28, %v70_v28  ;;  %v87_v34 = vadd.f32 %v86_v25, %v84_v29  ;;  %v101_v35 = vadd.f32 %v100_v31, %v97_v30 }
  0x3f   :  { %v89_v36 = vmul.f32 %v87_v34, %v87_v34  ;;  %v104_v37 = vadd.f32 %v103_v32, %v101_v35  ;;  %v112_v38 = vrot.slane %v72_v33, %v111_v27  ;;  %v118_v39 = vrot.slane %v87_v34, %v111_v27 }
  0x41   :  { %v106_v40 = vmul.f32 %v104_v37, %v104_v37  ;;  %v124_v41 = vrot.slane %v89_v36, %v111_v27  ;;  %v130_v42 = vrot.slane %v104_v37, %v111_v27  ;;  %v139_v43 = vsel %vm138_vm0, %v70_v28, %v112_v38 }
  0x42   :  { %v141_v44 = vsel %vm140_vm1, %v139_v43, %v118_v39 }
  0x43   :  { %v136_v45 = vrot.slane %v106_v40, %v111_v27  ;;  %v143_v46 = vsel %vm142_vm2, %v141_v44, %v124_v41 }
  0x44   :  { %v145_v47 = vsel %vm144_vm3, %v143_v46, %v130_v42 }
  0x45   :  { %v147_v48 = vsel %vm146_vm4, %v145_v47, %v136_v45 }
  0x46   :  { %v149_v49 = vsel %vm148_vm5, %v147_v48, 0.0 }
  0x47   :  { %150 = vst [vmem:[#allocation9] sm:$0xff] %v149_v49 }
  0x48   :  { %239 = shalt.err (!%p236_p6)
}
  0x49   :  { %s240_s29 = scalar_lea.hbm %s335_s3, 128 }
  0x4a   :  { %p241_p7 = scmp.ne.s32.totalorder %s335_s3, %s240_s29  ;;  %p244_p8 = scmp.lt.u32.totalorder %s240_s29, %s335_s3 }
  0x4c   :  { %p246_p9 = pnand %p244_p8, %p241_p7 }
  0x4e   :  { %249 = shalt.err (!%p246_p9)
}
  0x4f   :  { %160 = dma.vmem_to_hbm [thread:$0]  %s158_s25, 128, %s335_s3, [#allocation4]  }
  0x50   :  { %256 = dma.done.wait [#allocation4], 128  }
  0x51   :  { %257 = vsyncadd [#allocation4], 4294967168 }
  0x52   :  { %164 = vsyncpa [#allocation3], 1 }
  0x53   :  { %165 = vsyncpa [#allocation4], 1 }
  0x54   :  { %166 = vsyncpa [#allocation5], 1 }
  0x55   :  { %167 = vsyncpa [#allocation6], 1 }

</bundles_post_ra>
